<compile_context>
chip_gen: v5e
topology: v5e:2x2
jax: 0.10.0
libtpu: 0.0.40
codegen_flags: <defaults>
</compile_context>

<pallas_src>
import functools

import jax
import jax.numpy as jnp
import numpy as np
from jax.experimental import pallas as pl
from jax.experimental.pallas import tpu as pltpu


# ----------------------- tiled linear projection (x @ W^T + b) -----------------------

def _linear_kernel(x_ref, w_ref, b_ref, o_ref, acc_ref):
    k = pl.program_id(2)

    @pl.when(k == 0)
    def _():
        acc_ref[...] = jnp.zeros_like(acc_ref)

    acc_ref[...] += jnp.dot(
        x_ref[...], w_ref[...], preferred_element_type=jnp.float32
    )

    @pl.when(k == pl.num_programs(2) - 1)
    def _():
        o_ref[...] = (acc_ref[...] + b_ref[...].astype(jnp.float32)).astype(o_ref.dtype)


def _pick_tile(dim, target, align):
    """Largest divisor of `dim` that is <= target and a multiple of `align`;
    falls back to the full extent (always a legal block size)."""
    if dim <= target:
        return dim
    t = (target // align) * align
    while t >= align:
        if dim % t == 0:
            return t
        t -= align
    return dim


def linear_pallas(x2d, w_t, b, *, out_dtype=None, tm=256, tn=256, tk=512):
    """y = x2d @ w_t + b, tiled with a K-reduction accumulator."""
    n, din = x2d.shape
    dout = w_t.shape[1]
    out_dtype = out_dtype or x2d.dtype

    tm = _pick_tile(n, tm, 8)
    tn = _pick_tile(dout, tn, 128)
    tk = _pick_tile(din, tk, 128)

    # Explicit VMEM budget (double-buffered inputs/outputs + f32 accumulator),
    # clamped so the same kernel stays inside v7x's tighter scoped VMEM.
    isz = jnp.dtype(x2d.dtype).itemsize
    osz = jnp.dtype(out_dtype).itemsize
    need = 2 * isz * (tm * tk + tk * tn + tn) + 2 * osz * tm * tn + 4 * tm * tn
    vmem_limit = int(min(max(4 * need, 16 * 1024 * 1024), 32 * 1024 * 1024))

    return pl.pallas_call(
        _linear_kernel,
        out_shape=jax.ShapeDtypeStruct((n, dout), out_dtype),
        grid_spec=pltpu.PrefetchScalarGridSpec(
            num_scalar_prefetch=0,
            grid=(n // tm, dout // tn, din // tk),
            in_specs=[
                pl.BlockSpec((tm, tk), lambda i, j, k: (i, k)),
                pl.BlockSpec((tk, tn), lambda i, j, k: (k, j)),
                pl.BlockSpec((1, tn), lambda i, j, k: (0, j)),
            ],
            out_specs=pl.BlockSpec((tm, tn), lambda i, j, k: (i, j)),
            scratch_shapes=[pltpu.VMEM((tm, tn), jnp.float32)],
        ),
        compiler_params=pltpu.CompilerParams(
            dimension_semantics=("parallel", "parallel", "arbitrary"),
            vmem_limit_bytes=vmem_limit,
        ),
    )(x2d, w_t, b.reshape(1, dout))


# ------------------------------- attention kernel -----------------------------------

def _attn_kernel(q_ref, k_ref, v_ref, o_ref, *, heads):
    # q_ref: (1, S, D)   k_ref / v_ref / o_ref: (1, 1, S, D)
    q = q_ref[0]       # (S, D)
    k = k_ref[0, 0]    # (S, D)
    v = v_ref[0, 0]    # (S, D)
    d_model = q.shape[-1]
    dk = d_model // heads

    outs = []
    for h in range(heads):                       # static unroll; heads is small
        lo = h * dk
        qh = q[:, lo:lo + dk]
        kh = k[:, lo:lo + dk]
        vh = v[:, lo:lo + dk]
        # NOTE: the PyTorch module does NOT scale scores by 1/sqrt(dk).
        s = jnp.dot(qh, kh.T, preferred_element_type=jnp.float32)   # (S_q, S_k), f32
        m = jnp.max(s, axis=-1, keepdims=True)
        e = jnp.exp(s - m)                                          # f32 softmax
        inv = pl.reciprocal(jnp.sum(e, axis=-1, keepdims=True), approx=False)
        p = e * inv
        outs.append(jnp.dot(p.astype(vh.dtype), vh,
                            preferred_element_type=jnp.float32))    # (S_q, dk)

    # Lane-dense store: all heads merged along the last (D-wide) axis.
    o_ref[0, 0] = jnp.concatenate(outs, axis=-1).astype(o_ref.dtype)


def attention_pallas(qp, kp, vp, heads, *, out_dtype=jnp.float32):
    # qp: (B, S, D); kp/vp: (B, T, S, D) -> out: (B, T, S, D)
    B, T, S, D = kp.shape
    kern = functools.partial(_attn_kernel, heads=heads)
    return pl.pallas_call(
        kern,
        out_shape=jax.ShapeDtypeStruct((B, T, S, D), out_dtype),
        grid=(B, T),   # T innermost; q index_map is t-independent -> q not re-fetched per t
        in_specs=[
            pl.BlockSpec((1, S, D), lambda b, t: (b, 0, 0)),
            pl.BlockSpec((1, 1, S, D), lambda b, t: (b, t, 0, 0)),
            pl.BlockSpec((1, 1, S, D), lambda b, t: (b, t, 0, 0)),
        ],
        out_specs=pl.BlockSpec((1, 1, S, D), lambda b, t: (b, t, 0, 0)),
        compiler_params=pltpu.CompilerParams(
            dimension_semantics=("parallel", "parallel"),
        ),
    )(qp, kp, vp)


# --------------------------------- module wrapper ------------------------------------

def init_params(key, d_model):
    """Deterministic synthetic parameters (shapes match nn.Linear(d_model, d_model))."""
    ks = jax.random.split(key, 6)
    std = 1.0 / np.sqrt(d_model)

    def w(kk):  # stored already transposed: (Din, Dout)
        return jax.random.normal(kk, (d_model, d_model), jnp.float32) * std

    def b(kk):
        return jax.random.normal(kk, (d_model,), jnp.float32) * std

    return {
        "wq_t": w(ks[0]), "bq": b(ks[1]),
        "wk_t": w(ks[2]), "bk": b(ks[3]),
        "wv_t": w(ks[4]), "bv": b(ks[5]),
    }


def multi_head_cross_attention(params, q, k, v, heads, *, compute_dtype=jnp.float32):
    B, T, S, D = k.shape
    cd = compute_dtype

    wq = params["wq_t"].astype(cd)
    wk = params["wk_t"].astype(cd)
    wv = params["wv_t"].astype(cd)

    # Projections (tiled Pallas matmuls). No head-split transposes afterwards:
    # the attention kernel reads (S, D) blocks and splits heads internally.
    qp = linear_pallas(q.reshape(B * S, D).astype(cd), wq, params["bq"],
                       out_dtype=cd).reshape(B, S, D)
    kp = linear_pallas(k.reshape(B * T * S, D).astype(cd), wk, params["bk"],
                       out_dtype=cd).reshape(B, T, S, D)
    vp = linear_pallas(v.reshape(B * T * S, D).astype(cd), wv, params["bv"],
                       out_dtype=cd).reshape(B, T, S, D)

    return attention_pallas(qp, kp, vp, heads, out_dtype=jnp.float32)


# ------------------------------ reference (pure jnp) ----------------------------------

def reference(params, q, k, v, heads):
    B, T, S, D = k.shape
    dk = D // heads
    qp = q @ params["wq_t"] + params["bq"]
    kp = k @ params["wk_t"] + params["bk"]
    vp = v @ params["wv_t"] + params["bv"]
    query = jnp.concatenate(jnp.split(qp, heads, axis=-1), axis=0)   # (B*H, S, dk)
    key = jnp.concatenate(jnp.split(kp, heads, axis=-1), axis=0)     # (B*H, T, S, dk)
    value = jnp.concatenate(jnp.split(vp, heads, axis=-1), axis=0)
    key2 = key.reshape(B * heads, -1, dk).transpose(0, 2, 1)
    aw = jnp.matmul(query, key2).reshape(B * heads, S, T, S)
    aw = jax.nn.softmax(aw, axis=-1)
    av = jnp.matmul(aw.transpose(0, 2, 1, 3), value)                 # (B*H, T, S, dk)
    return jnp.concatenate(jnp.split(av, heads, axis=0), axis=-1)    # (B, T, S, D)


# --------------------------------------- main -----------------------------------------

if __name__ == "__main__":
    B, T, S, D, HEADS = 2, 3, 8, 32, 4   # batch, hist_size, seq_len, d_model, heads

    root = jax.random.PRNGKey(0)
    kp_, kq_, kk_, kv_ = jax.random.split(root, 4)

    params = init_params(kp_, D)
    q = jax.random.normal(kq_, (B, S, D), jnp.float32)
    k = jax.random.normal(kk_, (B, T, S, D), jnp.float32)
    v = jax.random.normal(kv_, (B, T, S, D), jnp.float32)

    ref = jax.block_until_ready(reference(params, q, k, v, HEADS))

    # f32 path: exact-ish match against the f32 reference.
    out = jax.block_until_ready(multi_head_cross_attention(params, q, k, v, HEADS))
    assert out.shape == (B, T, S, D), out.shape
    assert np.allclose(np.asarray(out), np.asarray(ref), atol=1e-4, rtol=1e-4)

    # bf16 MXU-input path (f32 accumulation + f32 softmax): loose sanity check only.
    out_bf16 = jax.block_until_ready(
        multi_head_cross_attention(params, q, k, v, HEADS, compute_dtype=jnp.bfloat16)
    )
    assert out_bf16.shape == (B, T, S, D)
    assert np.allclose(np.asarray(out_bf16), np.asarray(ref), atol=1e-1, rtol=1e-1)

    print("KERNEL_OK")
</pallas_src>

<mosaic_0001>
module attributes {stable_mosaic.version = 11 : i64} {
  func.func @_linear_kernel(%arg0: i32, %arg1: i32, %arg2: i32, %arg3: memref<16x32xf32, #tpu.memory_space<vmem>>, %arg4: memref<32x32xf32, #tpu.memory_space<vmem>>, %arg5: memref<1x32xf32, #tpu.memory_space<vmem>>, %arg6: memref<16x32xf32, #tpu.memory_space<vmem>>, %arg7: memref<16x32xf32, #tpu.memory_space<vmem>>) attributes {dimension_semantics = [#tpu.dimension_semantics<parallel>, #tpu.dimension_semantics<parallel>, #tpu.dimension_semantics<arbitrary>], iteration_bounds = array<i64: 1, 1, 1>, scalar_prefetch = 0 : i64, scratch_operands = 1 : i64, tpu.core_type = #tpu.core_type<tc>, window_params = [{transform_indices = @transform_0, window_bounds = array<i64: 16, 32>}, {transform_indices = @transform_1, window_bounds = array<i64: 32, 32>}, {transform_indices = @transform_2, window_bounds = array<i64: 1, 32>}, {transform_indices = @transform_3, window_bounds = array<i64: 16, 32>}]} {
    %c0_i32 = arith.constant 0 : i32
    %0 = arith.cmpi eq, %arg2, %c0_i32 : i32
    %1 = arith.extui %0 : i1 to i32
    %c0_i32_0 = arith.constant 0 : i32
    %2 = arith.cmpi ne, %1, %c0_i32_0 : i32
    scf.if %2 {
      %cst_10 = arith.constant 0.000000e+00 : f32
      %12 = vector.broadcast %cst_10 : f32 to vector<16x32xf32>
      %c0_11 = arith.constant 0 : index
      %c0_12 = arith.constant 0 : index
      %13 = vector.load %arg7[%c0_11, %c0_12] : memref<16x32xf32, #tpu.memory_space<vmem>>, vector<16x32xf32>
      tpu.vector_store %arg7[%c0_11, %c0_12], %12 {strides = array<i32>} : memref<16x32xf32, #tpu.memory_space<vmem>>, vector<16x32xf32>,
    } else {
    }
    %c0 = arith.constant 0 : index
    %c0_1 = arith.constant 0 : index
    %3 = vector.load %arg7[%c0, %c0_1] : memref<16x32xf32, #tpu.memory_space<vmem>>, vector<16x32xf32>
    %c0_2 = arith.constant 0 : index
    %c0_3 = arith.constant 0 : index
    %4 = vector.load %arg3[%c0_2, %c0_3] : memref<16x32xf32, #tpu.memory_space<vmem>>, vector<16x32xf32>
    %c0_4 = arith.constant 0 : index
    %c0_5 = arith.constant 0 : index
    %5 = vector.load %arg4[%c0_4, %c0_5] : memref<32x32xf32, #tpu.memory_space<vmem>>, vector<32x32xf32>
    %cst = arith.constant dense<0.000000e+00> : vector<16x32xf32>
    %6 = tpu.matmul %4, %5, %cst {dimension_numbers = #tpu.dot_dimension_numbers<[1], [0], [0], [1], [0, 0, 1, 1], [], []>} : vector<16x32xf32>, vector<32x32xf32>, vector<16x32xf32> -> vector<16x32xf32>
    %7 = arith.addf %3, %6 : vector<16x32xf32>
    %c0_6 = arith.constant 0 : index
    %c0_7 = arith.constant 0 : index
    %8 = vector.load %arg7[%c0_6, %c0_7] : memref<16x32xf32, #tpu.memory_space<vmem>>, vector<16x32xf32>
    tpu.vector_store %arg7[%c0_6, %c0_7], %7 {strides = array<i32>} : memref<16x32xf32, #tpu.memory_space<vmem>>, vector<16x32xf32>,
    %c0_i32_8 = arith.constant 0 : i32
    %9 = arith.cmpi eq, %arg2, %c0_i32_8 : i32
    %10 = arith.extui %9 : i1 to i32
    %c0_i32_9 = arith.constant 0 : i32
    %11 = arith.cmpi ne, %10, %c0_i32_9 : i32
    scf.if %11 {
      %c0_10 = arith.constant 0 : index
      %c0_11 = arith.constant 0 : index
      %12 = vector.load %arg7[%c0_10, %c0_11] : memref<16x32xf32, #tpu.memory_space<vmem>>, vector<16x32xf32>
      %c0_12 = arith.constant 0 : index
      %c0_13 = arith.constant 0 : index
      %13 = vector.load %arg5[%c0_12, %c0_13] : memref<1x32xf32, #tpu.memory_space<vmem>>, vector<1x32xf32>
      %14 = vector.broadcast %13 : vector<1x32xf32> to vector<16x32xf32>
      %15 = arith.addf %12, %14 : vector<16x32xf32>
      %c0_14 = arith.constant 0 : index
      %c0_15 = arith.constant 0 : index
      %16 = vector.load %arg6[%c0_14, %c0_15] : memref<16x32xf32, #tpu.memory_space<vmem>>, vector<16x32xf32>
      tpu.vector_store %arg6[%c0_14, %c0_15], %15 {strides = array<i32>} : memref<16x32xf32, #tpu.memory_space<vmem>>, vector<16x32xf32>,
    } else {
    }
    return
  }
  func.func @transform_0(%arg0: i32, %arg1: i32, %arg2: i32) -> (i32, i32) {
    %c0_i32 = arith.constant 0 : i32
    return %arg0, %arg2 : i32, i32
  }
  func.func @transform_1(%arg0: i32, %arg1: i32, %arg2: i32) -> (i32, i32) {
    %c0_i32 = arith.constant 0 : i32
    return %arg2, %arg1 : i32, i32
  }
  func.func @transform_2(%arg0: i32, %arg1: i32, %arg2: i32) -> (i32, i32) {
    %c0_i32 = arith.constant 0 : i32
    %c0_i32_0 = arith.constant 0 : i32
    return %c0_i32, %arg1 : i32, i32
  }
  func.func @transform_3(%arg0: i32, %arg1: i32, %arg2: i32) -> (i32, i32) {
    %c0_i32 = arith.constant 0 : i32
    return %arg0, %arg1 : i32, i32
  }
}

</mosaic_0001>

<bundles_post_ra>
// kernel: tpu_custom_call.1
= control target key start
LH: loop header
LB: loop body
LE: loop exit
PB: predicated region body
PF: predicated region fallthrough
CT: control target
= control target key end

     0   :  { %8 = vsyncpa [#allocation4], 0  ;;  %s275_s0 = inlined_call_operand.hbm [shape: f32[16,32], index: 0, kind: input, shape index: {}]   ;;  %s276_s1 = inlined_call_operand.hbm [shape: f32[32,32], index: 1, kind: input, shape index: {}]   ;;  %s277_s2 = inlined_call_operand.vmem [shape: f32[1,32], index: 2, kind: input, shape index: {}]   ;;  %s278_s3 = inlined_call_operand.hbm [shape: f32[16,32], index: 3, kind: output, shape index: {}]  }
   0x1   :  { %9 = vsyncpa [#allocation7], 0 }
   0x2   :  { %10 = vsyncpa [#allocation5], 0  ;;  %s15_s14 = sshll.u32 %s275_s0, 4  ;;  %s220_s15 = smov [#allocation3]   ;;  %s16_s14 = int_to_ptr.hbm [resolvable:$true] %s15_s14 }
   0x3   :  { %s17_s16 = sshll.u32 %s220_s15, 4  ;;  %s28_s19 = sshll.u32 %s276_s1, 4  ;;  %s18_s16 = int_to_ptr.vmem [resolvable:$true] %s17_s16  ;;  %s29_s19 = int_to_ptr.hbm [resolvable:$true] %s28_s19 }
   0x4   :  { %s221_s20 = smov 128   ;;  %s222_s21 = smov 8  }
   0x5   :  { %23 = dma.hbm_to_vmem [thread:$0]  %s16_s14, 256, %s18_s16, [#allocation4], %s221_s20, %s221_s20, %s222_s21  }
   0x6   :  { %s223_s22 = smov [#allocation6]  }
   0x7   :  { %s30_s23 = sshll.u32 %s223_s22, 4  ;;  %s31_s23 = int_to_ptr.vmem [resolvable:$true] %s30_s23 }
   0x8   :  { %36 = dma.hbm_to_vmem [thread:$0]  %s29_s19, 512, %s31_s23, [#allocation7], %s221_s20, %s221_s20, %s222_s21  }
   0x9   :  { %214 = dma.done.wait [#allocation4], 256  }
   0xa   :  { %215 = vsyncadd [#allocation4], 4294967040 }
   0xb   :  { %216 = dma.done.wait [#allocation7], 512  }
   0xc   :  { %217 = vsyncadd [#allocation7], 4294966784  ;;  %vm51_vm0 = vcmask 261120   ;;  %v224_v0 = vmov 0.0   ;;  %v61_v1 = vld [vmem:[#allocation6 + $0x18] sm:$0xff]  ;;  %v60_v2 = vld [vmem:[#allocation6 + $0x10] sm:$0xff] }
   0xd   :  { %52 = vst.msk [vmem:[#allocation2] sm:$0xff] %vm51_vm0, %v224_v0  ;;  %81 = vmatpush.msra.mxu0 %v61_v1  ;;  %131 = vmatpush.msra.mxu1 %v61_v1  ;;  %v59_v3 = vld [vmem:[#allocation6 + $0x8] sm:$0xff]  ;;  %v58_v4 = vld [vmem:[#allocation6] sm:$0xff]  ;;  %v56_v5 = vld [vmem:[#allocation3] sm:$0xff]  ;;  %s225_s24 = smov [#allocation8]   ;;  %s115_s28 = sshll.u32 %s278_s3, 4  ;;  %s116_s28 = int_to_ptr.hbm [resolvable:$true] %s115_s28 }
   0xe   :  { %53 = vst.msk [vmem:[#allocation2 + $0x8] sm:$0xff] %vm51_vm0, %v224_v0  ;;  %v57_v6 = vld [vmem:[#allocation3 + $0x8] sm:$0xff]  ;;  %v141_v13 = vld [vmem:[%s277_s2] ss:$0 sm:$0xff]  ;;  %s113_s25 = sshll.u32 %s225_s24, 4  ;;  %s114_s25 = int_to_ptr.vmem [resolvable:$true] %s113_s25 }
   0xf   :  { %82 = vmatpush.msra.mxu0 %v60_v2  ;;  %132 = vmatpush.msra.mxu1 %v60_v2 }
  0x11   :  { %83 = vmatpush.msra.mxu0 %v59_v3  ;;  %133 = vmatpush.msra.mxu1 %v59_v3 }
  0x13   :  { %84 = vmatpush.msra.mxu0 %v58_v4  ;;  %134 = vmatpush.msra.mxu1 %v58_v4 }
  0x14   :  { %129 = vmatmul.msk.f32.vlgmr.msra.gmra.mxu0 %vm51_vm0, %v56_v5  ;;  %130 = vmatmul.msk.f32.vlgmr.msra.gmra.mxu1 %vm51_vm0, %v57_v6  ;;  %v54_v7 = vld [vmem:[#allocation2] sm:$0xff] }
  0x15   :  { %v55_v8 = vld [vmem:[#allocation2 + $0x8] sm:$0xff] }
  0x91   :  { %v86_v9 = vpop.f32.mrf.mxu0  ;;  %v89_v10 = vpop.f32.mrf.mxu1 }
  0x92   :  { %v92_v11 = vadd.f32 %v86_v9, %v54_v7  ;;  %v93_v12 = vadd.f32 %v89_v10, %v55_v8 }
  0x94   :  { %94 = vst.msk [vmem:[#allocation2] sm:$0xff] %vm51_vm0, %v92_v11 }
  0x95   :  { %95 = vst.msk [vmem:[#allocation2 + $0x8] sm:$0xff] %vm51_vm0, %v93_v12 }
  0x9b   :  { %v99_v14 = vld [vmem:[#allocation2] sm:$0xff] }
  0x9c   :  { %v100_v15 = vld [vmem:[#allocation2 + $0x8] sm:$0xff]  ;;  %v105_v16 = vadd.f32 %v141_v13, %v99_v14 }
  0x9d   :  { %v106_v17 = vadd.f32 %v141_v13, %v100_v15 }
  0x9e   :  { %107 = vst.msk [vmem:[#allocation8] sm:$0xff] %vm51_vm0, %v105_v16 }
  0x9f   :  { %108 = vst.msk [vmem:[#allocation8 + $0x8] sm:$0xff] %vm51_vm0, %v106_v17 }
  0xa0   :  { %121 = dma.vmem_to_hbm [thread:$0]  %s114_s25, 256, %s116_s28, [#allocation5], %s221_s20, %s221_s20, %s222_s21  }
  0xa1   :  { %218 = dma.done.wait [#allocation5], 256  }
  0xa2   :  { %219 = vsyncadd [#allocation5], 4294967040 }
  0xa3   :  { %126 = vsyncpa [#allocation4], 1 }
  0xa4   :  { %127 = vsyncpa [#allocation7], 1 }
  0xa5   :  { %128 = vsyncpa [#allocation5], 1 }

</bundles_post_ra>
